<compile_context>
chip_gen: v7x
topology: tpu7x:2x2x1
jax: 0.10.0
libtpu: 0.0.40
codegen_flags: <defaults>
</compile_context>

<pallas_src>
import jax
import jax.numpy as jnp
from jax import lax
from jax.experimental import pallas as pl
from jax.experimental.pallas import tpu as pltpu


def cross_attention_kernel(depth_q_ref, depth_k_ref, rgb_ref,
                           wq_ref, wk_ref, wv_ref,
                           out_ref,
                           q_sc, m_sc, l_sc, acc_sc):
    """One (batch, query_tile) block, iterated over key tiles (grid axis 2).

    depth_q_ref : (1, C+1, TQ)  bf16   depth slab for the query tile
    depth_k_ref : (1, C+1, TK)  bf16   depth slab for the key tile
    rgb_ref     : (1, C+1, TK)  bf16   rgb slab for the key tile
    wq_ref/wk_ref : (Cq, C+1)   bf16   1x1-conv weights with bias column
    wv_ref        : (C,  C+1)   bf16
    out_ref     : (1, C, TQ)    f32
    q_sc : (Cq, TQ) bf16 | m_sc, l_sc : (1, TQ) f32 | acc_sc : (C, TQ) f32
    """
    ki = pl.program_id(2)

    @pl.when(ki == 0)
    def _init():
        # Query projection for this query tile (bias folded via ones-channel).
        q = jnp.dot(wq_ref[...], depth_q_ref[0],
                    preferred_element_type=jnp.float32)          # (Cq, TQ)
        q_sc[...] = q.astype(q_sc.dtype)
        m_sc[...] = jnp.full_like(m_sc, -jnp.inf)
        l_sc[...] = jnp.zeros_like(l_sc)
        acc_sc[...] = jnp.zeros_like(acc_sc)

    # Key / value projections for this key tile (bf16 MXU, f32 accumulate).
    k = jnp.dot(wk_ref[...], depth_k_ref[0],
                preferred_element_type=jnp.float32).astype(jnp.bfloat16)  # (Cq, TK)
    v = jnp.dot(wv_ref[...], rgb_ref[0],
                preferred_element_type=jnp.float32).astype(jnp.bfloat16)  # (C, TK)

    # Key-major scores: s_t[j, i] = sum_c k[c, j] * q[c, i]   -> (TK, TQ)
    s_t = lax.dot_general(k, q_sc[...], (((0,), (0,)), ((), ())),
                          preferred_element_type=jnp.float32)

    # Online softmax along the key axis (sublane axis); statistics are (1, TQ)
    # rows that broadcast over sublanes. All elementwise math in f32.
    m_prev = m_sc[...]
    m_new = jnp.maximum(m_prev, jnp.max(s_t, axis=0, keepdims=True))
    alpha = jnp.exp(m_prev - m_new)                              # (1, TQ)
    p = jnp.exp(s_t - m_new)                                     # (TK, TQ) unnormalized
    l_sc[...] = alpha * l_sc[...] + jnp.sum(p, axis=0, keepdims=True)
    acc_sc[...] = alpha * acc_sc[...] + jnp.dot(
        v, p.astype(jnp.bfloat16), preferred_element_type=jnp.float32)  # (C, TQ)
    m_sc[...] = m_new

    @pl.when(ki == pl.num_programs(2) - 1)
    def _finalize():
        # Deferred softmax normalization: one reciprocal per query column (EUP).
        inv_l = pl.reciprocal(l_sc[...], approx=True)            # (1, TQ)
        out_ref[0] = (acc_sc[...] * inv_l).astype(out_ref.dtype)


def _pick_tile(hw, target):
    """Largest multiple of 128 that divides hw and is <= target; else full hw."""
    if hw % 128 != 0:
        return hw                 # block == full dim is always legal
    t = max(128, (min(target, hw) // 128) * 128)
    while hw % t != 0:
        t -= 128
    return t


def cross_attention(rgb, depth, params, *, q_tile=256, k_tile=256):
    """rgb, depth: NCHW float32. Returns NCHW output matching PyTorch forward."""
    B, C, H, W = rgb.shape
    HW = H * W
    wq, bq = params["wq"], params["bq"]
    wk, bk = params["wk"], params["bk"]
    wv, bv = params["wv"], params["bv"]
    Cq = wq.shape[0]

    TQ = _pick_tile(HW, q_tile)
    TK = _pick_tile(HW, k_tile)

    # Fold biases into the matmuls: ones-channel on the inputs, bias column on
    # the weights. Pre-cast MXU operands to bf16 (softmax math stays f32).
    ones = jnp.ones((B, 1, HW), rgb.dtype)
    depth_aug = jnp.concatenate([depth.reshape(B, C, HW), ones],
                                axis=1).astype(jnp.bfloat16)       # (B, C+1, HW)
    rgb_aug = jnp.concatenate([rgb.reshape(B, C, HW), ones],
                              axis=1).astype(jnp.bfloat16)         # (B, C+1, HW)
    wq_aug = jnp.concatenate([wq, bq[:, None]], axis=1).astype(jnp.bfloat16)
    wk_aug = jnp.concatenate([wk, bk[:, None]], axis=1).astype(jnp.bfloat16)
    wv_aug = jnp.concatenate([wv, bv[:, None]], axis=1).astype(jnp.bfloat16)

    full = lambda b, qi, ki: (0, 0)   # weights: same full block every step

    out = pl.pallas_call(
        cross_attention_kernel,
        out_shape=jax.ShapeDtypeStruct((B, C, HW), rgb.dtype),
        grid_spec=pltpu.PrefetchScalarGridSpec(
            num_scalar_prefetch=0,
            grid=(B, HW // TQ, HW // TK),
            in_specs=[
                pl.BlockSpec((1, C + 1, TQ), lambda b, qi, ki: (b, 0, qi)),  # depth -> q
                pl.BlockSpec((1, C + 1, TK), lambda b, qi, ki: (b, 0, ki)),  # depth -> k
                pl.BlockSpec((1, C + 1, TK), lambda b, qi, ki: (b, 0, ki)),  # rgb   -> v
                pl.BlockSpec((Cq, C + 1), full),                             # wq|bq
                pl.BlockSpec((Cq, C + 1), full),                             # wk|bk
                pl.BlockSpec((C, C + 1), full),                              # wv|bv
            ],
            out_specs=pl.BlockSpec((1, C, TQ), lambda b, qi, ki: (b, 0, qi)),
            scratch_shapes=[
                pltpu.VMEM((Cq, TQ), jnp.bfloat16),   # query tile (held over k steps)
                pltpu.VMEM((1, TQ), jnp.float32),     # running max
                pltpu.VMEM((1, TQ), jnp.float32),     # running denominator
                pltpu.VMEM((C, TQ), jnp.float32),     # unnormalized output accumulator
            ],
        ),
        compiler_params=pltpu.CompilerParams(
            # batch & query tiles feed both v7x TensorCores; key axis reduces.
            dimension_semantics=("parallel", "parallel", "arbitrary"),
            vmem_limit_bytes=32 * 1024 * 1024,        # explicit, ample headroom
        ),
    )(depth_aug, depth_aug, rgb_aug, wq_aug, wk_aug, wv_aug)

    return out.reshape(B, C, H, W)


def reference(rgb, depth, params):
    """Pure-JAX f32 reference mirroring the PyTorch forward exactly."""
    B, C, H, W = rgb.shape
    HW = H * W
    wq, bq, wk, bk, wv, bv = (params["wq"], params["bq"], params["wk"],
                              params["bk"], params["wv"], params["bv"])
    d = depth.reshape(B, C, HW)
    r = rgb.reshape(B, C, HW)
    q = jnp.einsum("qc,bcn->bqn", wq, d) + bq[None, :, None]   # (B, Cq, HW)
    k = jnp.einsum("qc,bcn->bqn", wk, d) + bk[None, :, None]   # (B, Cq, HW)
    v = jnp.einsum("oc,bcn->bon", wv, r) + bv[None, :, None]   # (B, C, HW)
    mask = jnp.einsum("bqi,bqj->bij", q, k)                    # bmm(q^T, k)
    mask = jax.nn.softmax(mask, axis=-1)
    feat = jnp.einsum("bcj,bij->bci", v, mask)                 # bmm(v, mask^T)
    return feat.reshape(B, C, H, W)


if __name__ == "__main__":
    B, C, H, W = 2, 32, 16, 16
    ratio = 8
    Cq = C // ratio

    key = jax.random.PRNGKey(0)
    k_rgb, k_depth, k_wq, k_bq, k_wk, k_bk, k_wv, k_bv = jax.random.split(key, 8)

    rgb = jax.random.normal(k_rgb, (B, C, H, W), dtype=jnp.float32)
    depth = jax.random.normal(k_depth, (B, C, H, W), dtype=jnp.float32)

    # deterministic synthetic parameters (Conv2d 1x1 weights, squeezed to 2-D)
    params = {
        "wq": 0.1 * jax.random.normal(k_wq, (Cq, C), dtype=jnp.float32),
        "bq": 0.1 * jax.random.normal(k_bq, (Cq,), dtype=jnp.float32),
        "wk": 0.1 * jax.random.normal(k_wk, (Cq, C), dtype=jnp.float32),
        "bk": 0.1 * jax.random.normal(k_bk, (Cq,), dtype=jnp.float32),
        "wv": 0.1 * jax.random.normal(k_wv, (C, C), dtype=jnp.float32),
        "bv": 0.1 * jax.random.normal(k_bv, (C,), dtype=jnp.float32),
    }

    ref = jax.block_until_ready(reference(rgb, depth, params))

    # Small tiles so the multi-key-tile online-softmax path is exercised at
    # this toy size (HW=256 -> 2 query tiles x 2 key tiles per batch element).
    out_tiled = jax.block_until_ready(
        cross_attention(rgb, depth, params, q_tile=128, k_tile=128))
    # Default (larger) tiles: single tile per batch element at this size.
    out_full = jax.block_until_ready(cross_attention(rgb, depth, params))

    assert out_tiled.shape == (B, C, H, W)
    # bf16 MXU operands + approx reciprocal => relaxed comparison vs f32 ref.
    assert jnp.allclose(out_tiled, ref, atol=2e-2, rtol=2e-2), "tiled mismatch"
    assert jnp.allclose(out_full, ref, atol=2e-2, rtol=2e-2), "full-tile mismatch"

    print("KERNEL_OK")
</pallas_src>

<mosaic_0001>
module attributes {stable_mosaic.version = 11 : i64} {
  func.func @cross_attention_kernel(%arg0: i32, %arg1: i32, %arg2: i32, %arg3: memref<1x33x128xbf16, #tpu.memory_space<vmem>>, %arg4: memref<1x33x128xbf16, #tpu.memory_space<vmem>>, %arg5: memref<1x33x128xbf16, #tpu.memory_space<vmem>>, %arg6: memref<4x33xbf16, #tpu.memory_space<vmem>>, %arg7: memref<4x33xbf16, #tpu.memory_space<vmem>>, %arg8: memref<32x33xbf16, #tpu.memory_space<vmem>>, %arg9: memref<1x32x128xf32, #tpu.memory_space<vmem>>, %arg10: memref<4x128xbf16, #tpu.memory_space<vmem>>, %arg11: memref<1x128xf32, #tpu.memory_space<vmem>>, %arg12: memref<1x128xf32, #tpu.memory_space<vmem>>, %arg13: memref<32x128xf32, #tpu.memory_space<vmem>>) attributes {dimension_semantics = [#tpu.dimension_semantics<parallel>, #tpu.dimension_semantics<parallel>, #tpu.dimension_semantics<arbitrary>], iteration_bounds = array<i64: 2, 2, 2>, scalar_prefetch = 0 : i64, scratch_operands = 4 : i64, tpu.core_type = #tpu.core_type<tc>, window_params = [{transform_indices = @transform_0, window_bounds = array<i64: 1, 33, 128>}, {transform_indices = @transform_1, window_bounds = array<i64: 1, 33, 128>}, {transform_indices = @transform_2, window_bounds = array<i64: 1, 33, 128>}, {pipeline_mode = #tpu.pipeline_mode<synchronous>, transform_indices = @transform_3, window_bounds = array<i64: 4, 33>}, {pipeline_mode = #tpu.pipeline_mode<synchronous>, transform_indices = @transform_4, window_bounds = array<i64: 4, 33>}, {pipeline_mode = #tpu.pipeline_mode<synchronous>, transform_indices = @transform_5, window_bounds = array<i64: 32, 33>}, {transform_indices = @transform_6, window_bounds = array<i64: 1, 32, 128>}]} {
    %c0_i32 = arith.constant 0 : i32
    %0 = arith.cmpi eq, %arg2, %c0_i32 : i32
    %1 = arith.extui %0 : i1 to i32
    %c0_i32_0 = arith.constant 0 : i32
    %2 = arith.cmpi ne, %1, %c0_i32_0 : i32
    scf.if %2 {
      %c0_30 = arith.constant 0 : index
      %c0_31 = arith.constant 0 : index
      %41 = vector.load %arg6[%c0_30, %c0_31] : memref<4x33xbf16, #tpu.memory_space<vmem>>, vector<4x33xbf16>
      %c0_32 = arith.constant 0 : index
      %c0_33 = arith.constant 0 : index
      %c0_34 = arith.constant 0 : index
      %42 = vector.load %arg3[%c0_32, %c0_33, %c0_34] : memref<1x33x128xbf16, #tpu.memory_space<vmem>>, vector<1x33x128xbf16>
      %43 = vector.shape_cast %42 : vector<1x33x128xbf16> to vector<33x128xbf16>
      %cst_35 = arith.constant dense<0.000000e+00> : vector<4x128xf32>
      %44 = tpu.matmul %41, %43, %cst_35 {dimension_numbers = #tpu.dot_dimension_numbers<[1], [0], [0], [1], [0, 0, 1, 1], [], []>} : vector<4x33xbf16>, vector<33x128xbf16>, vector<4x128xf32> -> vector<4x128xf32>
      %45 = arith.truncf %44 : vector<4x128xf32> to vector<4x128xbf16>
      %c0_36 = arith.constant 0 : index
      %c0_37 = arith.constant 0 : index
      %46 = vector.load %arg10[%c0_36, %c0_37] : memref<4x128xbf16, #tpu.memory_space<vmem>>, vector<4x128xbf16>
      tpu.vector_store %arg10[%c0_36, %c0_37], %45 {strides = array<i32>} : memref<4x128xbf16, #tpu.memory_space<vmem>>, vector<4x128xbf16>,
      %cst_38 = arith.constant 0xFF800000 : f32
      %47 = vector.broadcast %cst_38 : f32 to vector<1x128xf32>
      %c0_39 = arith.constant 0 : index
      %c0_40 = arith.constant 0 : index
      %48 = vector.load %arg11[%c0_39, %c0_40] : memref<1x128xf32, #tpu.memory_space<vmem>>, vector<1x128xf32>
      tpu.vector_store %arg11[%c0_39, %c0_40], %47 {strides = array<i32>} : memref<1x128xf32, #tpu.memory_space<vmem>>, vector<1x128xf32>,
      %cst_41 = arith.constant 0.000000e+00 : f32
      %49 = vector.broadcast %cst_41 : f32 to vector<1x128xf32>
      %c0_42 = arith.constant 0 : index
      %c0_43 = arith.constant 0 : index
      %50 = vector.load %arg12[%c0_42, %c0_43] : memref<1x128xf32, #tpu.memory_space<vmem>>, vector<1x128xf32>
      tpu.vector_store %arg12[%c0_42, %c0_43], %49 {strides = array<i32>} : memref<1x128xf32, #tpu.memory_space<vmem>>, vector<1x128xf32>,
      %cst_44 = arith.constant 0.000000e+00 : f32
      %51 = vector.broadcast %cst_44 : f32 to vector<32x128xf32>
      %c0_45 = arith.constant 0 : index
      %c0_46 = arith.constant 0 : index
      %52 = vector.load %arg13[%c0_45, %c0_46] : memref<32x128xf32, #tpu.memory_space<vmem>>, vector<32x128xf32>
      tpu.vector_store %arg13[%c0_45, %c0_46], %51 {strides = array<i32>} : memref<32x128xf32, #tpu.memory_space<vmem>>, vector<32x128xf32>,
    } else {
    }
    %c0 = arith.constant 0 : index
    %c0_1 = arith.constant 0 : index
    %3 = vector.load %arg7[%c0, %c0_1] : memref<4x33xbf16, #tpu.memory_space<vmem>>, vector<4x33xbf16>
    %c0_2 = arith.constant 0 : index
    %c0_3 = arith.constant 0 : index
    %c0_4 = arith.constant 0 : index
    %4 = vector.load %arg4[%c0_2, %c0_3, %c0_4] : memref<1x33x128xbf16, #tpu.memory_space<vmem>>, vector<1x33x128xbf16>
    %5 = vector.shape_cast %4 : vector<1x33x128xbf16> to vector<33x128xbf16>
    %cst = arith.constant dense<0.000000e+00> : vector<4x128xf32>
    %6 = tpu.matmul %3, %5, %cst {dimension_numbers = #tpu.dot_dimension_numbers<[1], [0], [0], [1], [0, 0, 1, 1], [], []>} : vector<4x33xbf16>, vector<33x128xbf16>, vector<4x128xf32> -> vector<4x128xf32>
    %7 = arith.truncf %6 : vector<4x128xf32> to vector<4x128xbf16>
    %c0_5 = arith.constant 0 : index
    %c0_6 = arith.constant 0 : index
    %8 = vector.load %arg8[%c0_5, %c0_6] : memref<32x33xbf16, #tpu.memory_space<vmem>>, vector<32x33xbf16>
    %c0_7 = arith.constant 0 : index
    %c0_8 = arith.constant 0 : index
    %c0_9 = arith.constant 0 : index
    %9 = vector.load %arg5[%c0_7, %c0_8, %c0_9] : memref<1x33x128xbf16, #tpu.memory_space<vmem>>, vector<1x33x128xbf16>
    %10 = vector.shape_cast %9 : vector<1x33x128xbf16> to vector<33x128xbf16>
    %cst_10 = arith.constant dense<0.000000e+00> : vector<32x128xf32>
    %11 = tpu.matmul %8, %10, %cst_10 {dimension_numbers = #tpu.dot_dimension_numbers<[1], [0], [0], [1], [0, 0, 1, 1], [], []>} : vector<32x33xbf16>, vector<33x128xbf16>, vector<32x128xf32> -> vector<32x128xf32>
    %12 = arith.truncf %11 : vector<32x128xf32> to vector<32x128xbf16>
    %c0_11 = arith.constant 0 : index
    %c0_12 = arith.constant 0 : index
    %13 = vector.load %arg10[%c0_11, %c0_12] : memref<4x128xbf16, #tpu.memory_space<vmem>>, vector<4x128xbf16>
    %cst_13 = arith.constant dense<0.000000e+00> : vector<128x128xf32>
    %14 = tpu.matmul %7, %13, %cst_13 {dimension_numbers = #tpu.dot_dimension_numbers<[0], [0], [1], [1], [0, 1, 1, 1], [], []>} : vector<4x128xbf16>, vector<4x128xbf16>, vector<128x128xf32> -> vector<128x128xf32>
    %c0_14 = arith.constant 0 : index
    %c0_15 = arith.constant 0 : index
    %15 = vector.load %arg11[%c0_14, %c0_15] : memref<1x128xf32, #tpu.memory_space<vmem>>, vector<1x128xf32>
    %cst_16 = arith.constant dense<0xFF800000> : vector<128xf32>
    %16 = vector.multi_reduction <maximumf>, %14, %cst_16 [0] : vector<128x128xf32> to vector<128xf32>
    %17 = vector.shape_cast %16 : vector<128xf32> to vector<1x128xf32>
    %18 = arith.maximumf %15, %17 : vector<1x128xf32>
    %19 = arith.subf %15, %18 : vector<1x128xf32>
    %20 = math.exp %19 : vector<1x128xf32>
    %21 = vector.broadcast %18 : vector<1x128xf32> to vector<128x128xf32>
    %22 = arith.subf %14, %21 : vector<128x128xf32>
    %23 = math.exp %22 : vector<128x128xf32>
    %c0_17 = arith.constant 0 : index
    %c0_18 = arith.constant 0 : index
    %24 = vector.load %arg12[%c0_17, %c0_18] : memref<1x128xf32, #tpu.memory_space<vmem>>, vector<1x128xf32>
    %25 = arith.mulf %20, %24 : vector<1x128xf32>
    %cst_19 = arith.constant dense<0.000000e+00> : vector<128xf32>
    %26 = vector.multi_reduction <add>, %23, %cst_19 [0] : vector<128x128xf32> to vector<128xf32>
    %27 = vector.shape_cast %26 : vector<128xf32> to vector<1x128xf32>
    %28 = arith.addf %25, %27 : vector<1x128xf32>
    %c0_20 = arith.constant 0 : index
    %c0_21 = arith.constant 0 : index
    %29 = vector.load %arg12[%c0_20, %c0_21] : memref<1x128xf32, #tpu.memory_space<vmem>>, vector<1x128xf32>
    tpu.vector_store %arg12[%c0_20, %c0_21], %28 {strides = array<i32>} : memref<1x128xf32, #tpu.memory_space<vmem>>, vector<1x128xf32>,
    %c0_22 = arith.constant 0 : index
    %c0_23 = arith.constant 0 : index
    %30 = vector.load %arg13[%c0_22, %c0_23] : memref<32x128xf32, #tpu.memory_space<vmem>>, vector<32x128xf32>
    %31 = vector.broadcast %20 : vector<1x128xf32> to vector<32x128xf32>
    %32 = arith.mulf %31, %30 : vector<32x128xf32>
    %33 = arith.truncf %23 : vector<128x128xf32> to vector<128x128xbf16>
    %cst_24 = arith.constant dense<0.000000e+00> : vector<32x128xf32>
    %34 = tpu.matmul %12, %33, %cst_24 {dimension_numbers = #tpu.dot_dimension_numbers<[1], [0], [0], [1], [0, 0, 1, 1], [], []>} : vector<32x128xbf16>, vector<128x128xbf16>, vector<32x128xf32> -> vector<32x128xf32>
    %35 = arith.addf %32, %34 : vector<32x128xf32>
    %c0_25 = arith.constant 0 : index
    %c0_26 = arith.constant 0 : index
    %36 = vector.load %arg13[%c0_25, %c0_26] : memref<32x128xf32, #tpu.memory_space<vmem>>, vector<32x128xf32>
    tpu.vector_store %arg13[%c0_25, %c0_26], %35 {strides = array<i32>} : memref<32x128xf32, #tpu.memory_space<vmem>>, vector<32x128xf32>,
    %c0_27 = arith.constant 0 : index
    %c0_28 = arith.constant 0 : index
    %37 = vector.load %arg11[%c0_27, %c0_28] : memref<1x128xf32, #tpu.memory_space<vmem>>, vector<1x128xf32>
    tpu.vector_store %arg11[%c0_27, %c0_28], %18 {strides = array<i32>} : memref<1x128xf32, #tpu.memory_space<vmem>>, vector<1x128xf32>,
    %c1_i32 = arith.constant 1 : i32
    %38 = arith.cmpi eq, %arg2, %c1_i32 : i32
    %39 = arith.extui %38 : i1 to i32
    %c0_i32_29 = arith.constant 0 : i32
    %40 = arith.cmpi ne, %39, %c0_i32_29 : i32
    scf.if %40 {
      %c0_30 = arith.constant 0 : index
      %c0_31 = arith.constant 0 : index
      %41 = vector.load %arg12[%c0_30, %c0_31] : memref<1x128xf32, #tpu.memory_space<vmem>>, vector<1x128xf32>
      %42 = tpu.reciprocal %41 {approx = true} : vector<1x128xf32> -> vector<1x128xf32>
      %c0_32 = arith.constant 0 : index
      %c0_33 = arith.constant 0 : index
      %43 = vector.load %arg13[%c0_32, %c0_33] : memref<32x128xf32, #tpu.memory_space<vmem>>, vector<32x128xf32>
      %44 = vector.broadcast %42 : vector<1x128xf32> to vector<32x128xf32>
      %45 = arith.mulf %43, %44 : vector<32x128xf32>
      %c0_34 = arith.constant 0 : index
      %c0_35 = arith.constant 0 : index
      %c0_36 = arith.constant 0 : index
      %46 = vector.load %arg9[%c0_34, %c0_35, %c0_36] : memref<1x32x128xf32, #tpu.memory_space<vmem>>, vector<1x32x128xf32>
      %47 = vector.shape_cast %46 : vector<1x32x128xf32> to vector<32x128xf32>
      %48 = vector.shape_cast %45 : vector<32x128xf32> to vector<1x32x128xf32>
      tpu.vector_store %arg9[%c0_34, %c0_35, %c0_36], %48 {strides = array<i32>} : memref<1x32x128xf32, #tpu.memory_space<vmem>>, vector<1x32x128xf32>,
    } else {
    }
    return
  }
  func.func @transform_0(%arg0: i32, %arg1: i32, %arg2: i32) -> (i32, i32, i32) {
    %c0_i32 = arith.constant 0 : i32
    %c0_i32_0 = arith.constant 0 : i32
    return %arg0, %c0_i32, %arg1 : i32, i32, i32
  }
  func.func @transform_1(%arg0: i32, %arg1: i32, %arg2: i32) -> (i32, i32, i32) {
    %c0_i32 = arith.constant 0 : i32
    %c0_i32_0 = arith.constant 0 : i32
    return %arg0, %c0_i32, %arg2 : i32, i32, i32
  }
  func.func @transform_2(%arg0: i32, %arg1: i32, %arg2: i32) -> (i32, i32, i32) {
    %c0_i32 = arith.constant 0 : i32
    %c0_i32_0 = arith.constant 0 : i32
    return %arg0, %c0_i32, %arg2 : i32, i32, i32
  }
  func.func @transform_3(%arg0: i32, %arg1: i32, %arg2: i32) -> (i32, i32) {
    %c0_i32 = arith.constant 0 : i32
    %c0_i32_0 = arith.constant 0 : i32
    %c0_i32_1 = arith.constant 0 : i32
    return %c0_i32, %c0_i32_0 : i32, i32
  }
  func.func @transform_4(%arg0: i32, %arg1: i32, %arg2: i32) -> (i32, i32) {
    %c0_i32 = arith.constant 0 : i32
    %c0_i32_0 = arith.constant 0 : i32
    %c0_i32_1 = arith.constant 0 : i32
    return %c0_i32, %c0_i32_0 : i32, i32
  }
  func.func @transform_5(%arg0: i32, %arg1: i32, %arg2: i32) -> (i32, i32) {
    %c0_i32 = arith.constant 0 : i32
    %c0_i32_0 = arith.constant 0 : i32
    %c0_i32_1 = arith.constant 0 : i32
    return %c0_i32, %c0_i32_0 : i32, i32
  }
  func.func @transform_6(%arg0: i32, %arg1: i32, %arg2: i32) -> (i32, i32, i32) {
    %c0_i32 = arith.constant 0 : i32
    %c0_i32_0 = arith.constant 0 : i32
    return %arg0, %c0_i32, %arg1 : i32, i32, i32
  }
}

</mosaic_0001>

<bundles_post_ra>
// kernel: tpu_custom_call.1
= control target key start
LH: loop header
LB: loop body
LE: loop exit
PB: predicated region body
PF: predicated region fallthrough
CT: control target
= control target key end

     0   :  { %s2046_s0 = inlined_call_operand.vmem [shape: bf16[2,33,256], index: 0, kind: input, shape index: {}]   ;;  %s2047_s1 = inlined_call_operand.vmem [shape: bf16[2,33,256], index: 1, kind: input, shape index: {}]   ;;  %s2048_s2 = inlined_call_operand.vmem [shape: bf16[2,33,256], index: 2, kind: input, shape index: {}]   ;;  %s2049_s3 = inlined_call_operand.vmem [shape: bf16[4,33], index: 3, kind: input, shape index: {}]   ;;  %s2050_s4 = inlined_call_operand.vmem [shape: bf16[4,33], index: 4, kind: input, shape index: {}]   ;;  %s2051_s5 = inlined_call_operand.vmem [shape: bf16[32,33], index: 5, kind: input, shape index: {}]   ;;  %s2052_s6 = inlined_call_operand.hbm [shape: f32[2,32,256], index: 6, kind: output, shape index: {}]  }
   0x1   :  { %2059 = sst [smem:[#allocation18_spill]] %s2052_s6 }
   0x2   :  { %11 = vsyncpa [#allocation10], 0 }
   0x3   :  { %13 = vsyncpa [#allocation10 + $0x1], 0  ;;  %s1722_s21 = smov 0   ;;  %s1724_s22 = smov 0  }
   0x4   :  { %s1726_s23 = smov 0   ;;  %s1728_s24 = smov 0  }
   0x5   :  { %s1730_s25 = smov 0   ;;  %s1732_s26 = smov 0  }
   0x6   :  { %s1734_s27 = smov 0   ;;  %s1736_s28 = smov 0  }
   0x7   :  { %s1738_s29 = smov 0   ;;  %s1740_s30 = smov 0  }
   0x8   :  { %s1742_s7 = smov 0   ;;  %s1744_s8 = smov 0  }
   0x9 LB: > { %2060 = sst [smem:[#allocation12_spill]] %s1630_s21  ;;  %s1240_s9 = sadd.s32 4294967295, %s1674_s8   ;;  %s1674_s8 = sphi %s1744_s8, %s19_s8   ;;  %s1670_s7 = sphi %s1742_s7, %s2087_s7   ;;  %s1666_s30 = sphi %s1740_s30, %s2086_s30   ;;  %s1662_s29 = sphi %s1738_s29, %s2085_s29   ;;  %s1658_s28 = sphi %s1736_s28, %s2084_s28   ;;  %s1654_s27 = sphi %s1734_s27, %s2083_s27   ;;  %s1650_s26 = sphi %s1732_s26, %s2082_s26   ;;  %s1646_s25 = sphi %s1730_s25, %s2081_s25   ;;  %s1642_s24 = sphi %s1728_s24, %s2080_s24   ;;  %s1638_s23 = sphi %s1726_s23, %s2079_s23   ;;  %s1634_s22 = sphi %s1724_s22, %s2078_s22   ;;  %s1630_s21 = sphi %s1722_s21, %s2077_s21  }
   0xa   : > { %2061 = sst [smem:[#allocation13_spill]] %s1654_s27  ;;  %s1241_s10 = sadd.s32 4294967294, %s1674_s8  }
   0xb   : > { %s31_s11 = sadd.s32 1, %s1662_s29  ;;  %s34_s12 = sadd.s32 1, %s1666_s30 }
   0xc   : > { %p32_p0 = scmp.ge.s32.totalorder %s31_s11, 2  ;;  %s38_s13 = sadd.s32 1, %s1670_s7 }
   0xd   : > { %p54_p1 = scmp.ne.s32.totalorder %s1646_s25, %s1642_s24  ;;  %s47_s14 = sadd.s32 1, %s1646_s25 }
   0xe   : > { %s2089_s11 = smov (%p32_p0, %s31_s11), 0  ;;  %s2091_s12 = smov (!%p32_p0, %s34_s12), %s1666_s30 }
   0xf   : > { %2062 = sst [smem:[#allocation14_spill]] %s2089_s11  ;;  %p55_p2 = scmp.eq.s32.totalorder %s1674_s8, 0 }
  0x10   : > { %p36_p3 = scmp.ge.s32.totalorder %s2091_s12, 2  ;;  %s71_s15 = ssub.s32 %s1662_s29, %s2089_s11 }
  0x11   : > { %p1799_p4 = por %p55_p2, %p54_p1  ;;  %p82_p5 = scmp.ne.s32.totalorder %s1638_s23, %s1634_s22 }
  0x12   : > { %s2093_s12 = smov (%p36_p3, %s2091_s12), 0  ;;  %s2095_s13 = smov (!%p36_p3, %s38_s13), %s1670_s7 }
  0x13   : > { %2064 = sst [smem:[#allocation15_spill]] %s2093_s12  ;;  %s43_s17 = ssub.s32 %s1666_s30, %s2093_s12 }
  0x14   : > { %p1810_p6 = por %p82_p5, %p55_p2  ;;  %p40_p7 = scmp.ge.s32.totalorder %s2095_s13, 2 }
  0x15   : > { %p205_p8 = scmp.eq.s32.totalorder %s1240_s9, 7  ;;  %p210_p9 = scmp.ne.s32.totalorder %s1642_s24, %s1630_s21 }
  0x16   : > { %p211_p10 = scmp.eq.s32.totalorder %s1241_s10, 7  ;;  %s2097_s13 = smov (%p40_p7, %s2095_s13), 0 }
  0x17   : > { %2066 = sst [smem:[#allocation16_spill]] %s2097_s13  ;;  %p1821_p11 = por %p205_p8, %p54_p1 }
  0x18   : > { %p1825_p12 = por %p211_p10, %p210_p9  ;;  %s42_s12 = ssub.s32 %s1670_s7, %s2097_s13 }
  0x19   : > { %s75_s11 = sadd.s32 1, %s1638_s23  ;;  %s44_s6 = sor.u32 %s43_s17, %s42_s12 }
  0x1a   : > { %s2068_s20 = scalar_select %p1825_p12, 1, 0 }
  0x1b   : > { %s72_s27 = sor.u32 %s71_s15, %s42_s12  ;;  %p45_p13 = scmp.eq.s32.totalorder %s44_s6, 0 }
  0x1c   : > { %2069 = sst [smem:[#allocation17_spill]] %s2068_s20  ;;  %p73_p0 = scmp.eq.s32.totalorder %s72_s27, 0 }
  0x1d   : > { %s1833_s9 = scalar_select %p45_p13, %s1646_s25, %s47_s14  }
  0x1e   : > { %s1836_s10 = scalar_select %p73_p0, %s1638_s23, %s75_s11  }
  0x1f   : > { %p1243_p2 = scmp.ge.s32.totalorder %s1674_s8, 8 }
  0x21   : > { %236 = sbr.rel (%p1243_p2) target bundleno = 70 (0x46), region = 28 }
  0x28   : > { %239 = sbr.rel (!%p1799_p4) target bundleno = 50 (0x32), region = 32  ;;  %s241_s20 = sand.u32 (%p1799_p4), 1, %s1646_s25  }
  0x29   : > { %s1381_s13 = smul.u32 (%p1799_p4), 10, %s1670_s7 }
  0x2a   : > { %s1380_s21 = smul.u32 (%p1799_p4), 20, %s241_s20 }
  0x2b   : > { %s245_s17 = sadd.s32 (%p1799_p4), %s1666_s30, %s1381_s13 }
  0x2c   : > { %s1244_s12 = sshll.u32 (%p1799_p4), %s245_s17, 2  ;;  %s243_s11 = scalar_lea.vmem (%p1799_p4), [#allocation6], %s1380_s21 }
  0x2d   : > { %s247_s14 = scalar_lea.vmem (%p1799_p4), %s2046_s0, %s1244_s12 }
  0x2e   : > { %v263_v0 = vld [vmem:[%s247_s14] sm:$0xf] (%p1799_p4)  ;;  %v265_v1 = vld [vmem:[%s247_s14 + $0x8] sm:$0xf] (%p1799_p4)  ;;  %v267_v2 = vld [vmem:[%s247_s14 + $0x10] sm:$0xf] (%p1799_p4) }
  0x2f   : > { %264 = vst [vmem:[%s243_s11] sm:$0xf] %v263_v0  ;;  %266 = vst [vmem:[%s243_s11 + $0x4] sm:$0xf] %v265_v1  ;;  %v269_v3 = vld [vmem:[%s247_s14 + $0x18] sm:$0xf] }
  0x30   : > { %268 = vst [vmem:[%s243_s11 + $0x8] sm:$0xf] %v267_v2  ;;  %v271_v4 = vld [vmem:[%s247_s14 + $0x20] sm:$0xf]  ;;  %270 = vst [vmem:[%s243_s11 + $0xc] sm:$0xf] %v269_v3 }
  0x31   : > { %272 = vst [vmem:[%s243_s11 + $0x10] sm:$0xf] %v271_v4 }
  0x32 PF: > { %305 = sbr.rel (!%p1810_p6) target bundleno = 60 (0x3c), region = 73  ;;  %s307_s13 = sand.u32 (%p1810_p6), 1, %s1638_s23  }
  0x33   : > { %s1383_s15 = smul.u32 (%p1810_p6), 10, %s1670_s7 }
  0x34   : > { %s1382_s16 = smul.u32 (%p1810_p6), 20, %s307_s13 }
  0x35   : > { %s311_s20 = sadd.s32 (%p1810_p6), %s1662_s29, %s1383_s15 }
  0x36   : > { %s1245_s17 = sshll.u32 (%p1810_p6), %s311_s20, 2  ;;  %s309_s27 = scalar_lea.vmem (%p1810_p6), [#allocation7], %s1382_s16 }
  0x37   : > { %s313_s6 = scalar_lea.vmem (%p1810_p6), %s2047_s1, %s1245_s17 }
  0x38   : > { %v329_v5 = vld [vmem:[%s313_s6] sm:$0xf] (%p1810_p6)  ;;  %v331_v6 = vld [vmem:[%s313_s6 + $0x8] sm:$0xf] (%p1810_p6)  ;;  %v333_v7 = vld [vmem:[%s313_s6 + $0x10] sm:$0xf] (%p1810_p6) }
  0x39   : > { %330 = vst [vmem:[%s309_s27] sm:$0xf] %v329_v5  ;;  %332 = vst [vmem:[%s309_s27 + $0x4] sm:$0xf] %v331_v6  ;;  %v335_v8 = vld [vmem:[%s313_s6 + $0x18] sm:$0xf] }
  0x3a   : > { %334 = vst [vmem:[%s309_s27 + $0x8] sm:$0xf] %v333_v7  ;;  %v337_v9 = vld [vmem:[%s313_s6 + $0x20] sm:$0xf]  ;;  %336 = vst [vmem:[%s309_s27 + $0xc] sm:$0xf] %v335_v8 }
  0x3b   : > { %338 = vst [vmem:[%s309_s27 + $0x10] sm:$0xf] %v337_v9 }
  0x3c PF: > { %371 = sbr.rel (!%p1810_p6) target bundleno = 70 (0x46), region = 114  ;;  %s373_s14 = sand.u32 (%p1810_p6), 1, %s1638_s23  }
  0x3d   : > { %s1385_s11 = smul.u32 (%p1810_p6), 10, %s1670_s7 }
  0x3e   : > { %s1384_s13 = smul.u32 (%p1810_p6), 20, %s373_s14 }
  0x3f   : > { %s377_s15 = sadd.s32 (%p1810_p6), %s1662_s29, %s1385_s11 }
  0x40   : > { %s1246_s20 = sshll.u32 (%p1810_p6), %s377_s15, 2  ;;  %s375_s12 = scalar_lea.vmem (%p1810_p6), [#allocation8], %s1384_s13 }
  0x41   : > { %s379_s21 = scalar_lea.vmem (%p1810_p6), %s2048_s2, %s1246_s20 }
  0x42   : > { %v395_v10 = vld [vmem:[%s379_s21] sm:$0xf] (%p1810_p6)  ;;  %v397_v11 = vld [vmem:[%s379_s21 + $0x8] sm:$0xf] (%p1810_p6)  ;;  %v399_v12 = vld [vmem:[%s379_s21 + $0x10] sm:$0xf] (%p1810_p6) }
  0x43   : > { %396 = vst [vmem:[%s375_s12] sm:$0xf] %v395_v10  ;;  %398 = vst [vmem:[%s375_s12 + $0x4] sm:$0xf] %v397_v11  ;;  %v401_v13 = vld [vmem:[%s379_s21 + $0x18] sm:$0xf] }
  0x44   : > { %400 = vst [vmem:[%s375_s12 + $0x8] sm:$0xf] %v399_v12  ;;  %v403_v14 = vld [vmem:[%s379_s21 + $0x20] sm:$0xf]  ;;  %402 = vst [vmem:[%s375_s12 + $0xc] sm:$0xf] %v401_v13 }
  0x45   : > { %404 = vst [vmem:[%s375_s12 + $0x10] sm:$0xf] %v403_v14 }
  0x46 PF: > { %p1247_p1 = scmp.ge.s32.totalorder %s1674_s8, 1  ;;  %p436_p3 = scmp.lt.s32.totalorder %s1674_s8, 9 }
  0x48   : > { %p437_p4 = pnand %p1247_p1, %p436_p3 }
  0x49   : > { %s1866_s18 = sand.u32 (!%p437_p4), 1, %s1642_s24   ;;  %s450_s6 = sand.u32 (!%p437_p4), 1, %s1634_s22  }
  0x4a   : > { %440 = sbr.rel (%p437_p4) target bundleno = 1213 (0x4bd), region = 155  ;;  %s1248_s14 = sshll.u32 (!%p437_p4), %s1866_s18, 5 }
  0x4b   : > { %s1386_s27 = smul.u32 (!%p437_p4), 20, %s1866_s18  ;;  %s1875_s16 = scalar_lea.vmem (!%p437_p4), [#allocation9], %s1248_s14 }
  0x4c   : > { %s1387_s11 = smul.u32 (!%p437_p4), 20, %s450_s6  ;;  %p1249_p5 = scmp.ne.s32.totalorder (!%p437_p4), %s1650_s26, 0 }
  0x4d   : > { %s445_s13 = scalar_lea.vmem (!%p437_p4), [#allocation6], %s1386_s27 }
  0x4e   : > { %s1871_s15 = scalar_lea.vmem (!%p437_p4), [#allocation7], %s1387_s11  ;;  %s1873_s20 = scalar_lea.vmem (!%p437_p4), [#allocation8], %s1387_s11 }
  0x51   : > { %498 = sbr.rel (%p1249_p5) target bundleno = 309 (0x135), region = 171  ;;  %v1501_v15 = vld [vmem:[%s445_s13] sm:$0xff] (!%p1249_p5)   ;;  %v1676_v16 = vmov (!%p1249_p5), 0.0   ;;  %v1502_v17 = vld [vmem:[%s445_s13 + $0x8] sm:$0xff] (!%p1249_p5)   ;;  %vm524_vm0 = vcmask (!%p1249_p5), 1040384   ;;  %v1677_v19 = vmov (!%p1249_p5), 0  }
  0x52   : > { %1311 = vmatprep.subr.bf16.mxu0 (!%p1249_p5), %v1676_v16  ;;  %573 = vst [vmem:[#allocation4] sm:$0x1] (!%p1249_p5), %v1676_v16  ;;  %574 = vst [vmem:[#allocation5] sm:$0xff] (!%p1249_p5), %v1676_v16  ;;  %v1503_v18 = vld [vmem:[%s445_s13 + $0x10] ss:$0 sps:$4 sm:$0x11] (!%p1249_p5)  }
  0x53   : > { %575 = vst [vmem:[#allocation5 + $0x8] sm:$0xff] (!%p1249_p5), %v1676_v16  ;;  %576 = vst [vmem:[#allocation5 + $0x10] sm:$0xff] (!%p1249_p5), %v1676_v16  ;;  %1312 = vmatpush3.bf16.msra.mxu0 (!%p1249_p5), %v1501_v15  ;;  %v526_v20 = vsel (!%p1249_p5), %vm524_vm0, 65535, %v1677_v19  ;;  %vm1678_vm1 = vmmov (!%p1249_p5), 0   ;;  %v499_v22 = vld [vmem:[%s2049_s3] sm:$0x3] (!%p1249_p5) }
  0x54   : > { %577 = vst [vmem:[#allocation5 + $0x18] sm:$0xff] (!%p1249_p5), %v1676_v16  ;;  %1313 = vmatprep.subr.bf16.mxu0 (!%p1249_p5), %v1676_v16  ;;  %1317 = vmatprep.mubr.msk.bf16.mxu0 (!%p1249_p5), %vm1678_vm1, %v1676_v16  ;;  %v528_v21 = vand.u32 (!%p1249_p5), %v1503_v18, %v526_v20  ;;  %vm520_vm2 = vcmask (!%p1249_p5), 269312   ;;  %v1679_v23 = vmov (!%p1249_p5), -inf  }
  0x55   : > { %572 = vst [vmem:[#allocation3] sm:$0x1] (!%p1249_p5), %v1679_v23 }
  0x57   : > { %1314 = vmatpush3.bf16.msra.mxu0 (!%p1249_p5), %v1502_v17 }
  0x58   : > { %1315 = vmatprep.subr.bf16.mxu0 %v1676_v16 }
  0x5b   : > { %1316 = vmatpush3.bf16.msra.mxu0 %v528_v21 }
  0x5e   : > { %1318 = vmatmul.mubr.msk.bf16.vlgmr.msra.gmra.mrb[0].mxu0 %vm520_vm2, %v499_v22 }
 0x131   : > { %v564_v24 = vpop.f32.mrb[0].mxu0 }
 0x132   : > { %v570_v25 = vpack.c.bf16 %v564_v24, %v564_v24  ;;  %v1319_v26 = vpop.f32.mrb[1].mxu0 }
 0x133   : > { %v567_v27 = vpop.f32.mrb[2].mxu0 }
 0x134   : > { %571 = vst [vmem:[#allocation2] sm:$0x3] %v570_v25  ;;  %v1320_v28 = vpop.f32.mrb[3].mxu0 }
 0x135 PF: > { %v1504_v29 = vld [vmem:[%s1871_s15] sm:$0xff]   ;;  %v1680_v30 = vmov 0.0   ;;  %v1505_v31 = vld [vmem:[%s1871_s15 + $0x8] sm:$0xff]   ;;  %vm603_vm3 = vcmask 1040384   ;;  %v1681_v33 = vmov 0   ;;  %vm1682_vm4 = vmmov 0  }
 0x136   : > { %1321 = vmatprep.subr.bf16.mxu0 %v1680_v30  ;;  %v1506_v32 = vld [vmem:[%s1871_s15 + $0x10] ss:$0 sps:$4 sm:$0x11]   ;;  %v605_v34 = vsel %vm603_vm3, 65535, %v1681_v33  ;;  %1327 = vmatprep.mubr.msk.bf16.mxu0 %vm1682_vm4, %v1680_v30  ;;  %v578_v36 = vld [vmem:[%s2050_s4] sm:$0x3]  ;;  %v914_v33 = vlaneseq }
 0x137   : > { %1322 = vmatpush3.bf16.msra.mxu0 %v1504_v29  ;;  %v607_v35 = vand.u32 %v1506_v32, %v605_v34  ;;  %vm599_vm5 = vcmask 269312   ;;  %vm786_vm6 = vcmask 1041408   ;;  %v1507_v44 = vld [vmem:[%s1873_s20] sm:$0xff]   ;;  %v1508_v45 = vld [vmem:[%s1873_s20 + $0x8] sm:$0xff]   ;;  %vm761_vm7 = vcmask 31744   ;;  %p1273_p6 = scmp.ne.s32.totalorder %s1650_s26, 1 }
 0x138   : > { %1323 = vmatprep.subr.bf16.mxu0 %v1680_v30  ;;  %v1509_v46 = vld [vmem:[%s1873_s20 + $0x10] ss:$0 sps:$4 sm:$0x11]   ;;  %1331 = vmatprep.subr.bf16.mxu1 %v1507_v44  ;;  %v1511_v49 = vld [vmem:[%s2051_s5 + $0x8] sm:$0xff]  }
 0x139   : > { %v1510_v47 = vld [vmem:[%s2051_s5] sm:$0xff]   ;;  %1332 = vmatpush3.bf16.msra.mxu1 %v1507_v44  ;;  %v691_v48 = vand.u32 %v1509_v46, %v605_v34 }
 0x13a   : > { %1337 = vmatprep.mubr.msk.bf16.mxu1 %vm599_vm5, %v1510_v47  ;;  %1333 = vmatprep.subr.bf16.mxu1 %v1508_v45 }
 0x13b   : > { %1324 = vmatpush3.bf16.msra.mxu0 %v1505_v31  ;;  %v744_v37 = vld [vmem:[#allocation2] sm:$0x3] }
 0x13c   : > { %1325 = vmatprep.subr.bf16.mxu0 %v1680_v30  ;;  %v788_v38 = vsel %vm786_vm6, %v744_v37, 0 }
 0x13d   : > { %1334 = vmatpush3.bf16.msra.mxu1 %v1508_v45 }
 0x13e   : > { %1335 = vmatprep.subr.bf16.mxu1 %v691_v48 }
 0x13f   : > { %1326 = vmatpush3.bf16.msra.mxu0 %v607_v35 }
 0x140   : > { %1379 = vmatprep.subr.msk.bf16.mxu0 %vm786_vm6, %v744_v37 }
 0x141   : > { %1336 = vmatpush3.bf16.msra.mxu1 %v691_v48 }
 0x142   : > { %1328 = vmatmul.mubr.msk.bf16.vlgmr.msra.gmra.mrb[0].mxu0 %vm599_vm5, %v578_v36  ;;  %v915_v36 = vshrl.u32 %v914_v33, 7 }
 0x143   : > { %1342 = vmatpush3.bf16.msra.mxu0 %v788_v38  ;;  %v887_v38 = vld [vmem:[#allocation3] sm:$0x1] }
 0x144   : > { %1338 = vmatmul.mubr.msk.bf16.vlgmr.msra.gmra.mrb[0].mxu1 %vm599_vm5, %v1511_v49 }
 0x215   : > { %v643_v39 = vpop.f32.mrb[0].mxu0 }
 0x216   : > { %v1329_v40 = vpop.f32.mrb[1].mxu0  ;;  %v649_v41 = vpack.c.bf16 %v643_v39, %v643_v39 }
 0x217   : > { %v646_v42 = vpop.f32.mrb[2].mxu0  ;;  %v1907_v58 = vpop.f32.mrb[0].mxu1  ;;  %v1940_v40 = vsub.s32 0, %v915_v36 }
 0x218   : > { %745 = vxpose.xlu0.c.b16.start.end [1/1] (short) %v649_v41, 128  ;;  %v1330_v43 = vpop.f32.mrb[3].mxu0  ;;  %v727_v59 = vpop.f32.mrb[1].mxu1 }
 0x219   : > { %v1909_v60 = vpop.f32.mrb[2].mxu1 }
 0x21a   : > { %v743_v61 = vpack.c.bf16 %v1909_v60, %v1907_v58  ;;  %v730_v62 = vpop.f32.mrb[3].mxu1 }
 0x21b   : > { %v742_v63 = vpack.c.bf16 %v730_v62, %v727_v59 }
 0x21d   : > { %1375 = vmatprep.mubr.bf16.mxu1 %v742_v63 }
 0x27e   : > { %v753_v50 = vpop.trf.xlu0 }
 0x27f   : > { %1343 = vmatprep.mubr.msk.bf16.mxu0 %vm761_vm7, %v753_v50 }
 0x282   : > { %v754_v51 = vpop.trf.xlu0 }
 0x283   : > { %1344 = vmatmul.mubr.msk.bf16.vlgmr.msra.gmra.mrb[4].mxu0 %vm761_vm7, %v754_v51 }
 0x286   : > { %v755_v52 = vpop.trf.xlu0 }
 0x287   : > { %1347 = vmatprep.mubr.msk.bf16.mxu0 %vm761_vm7, %v755_v52 }
 0x28a   : > { %v756_v53 = vpop.trf.xlu0 }
 0x28b   : > { %1348 = vmatmul.mubr.msk.bf16.gmra.mrb[8].mxu0 %vm761_vm7, %v756_v53 }
 0x28e   : > { %v757_v54 = vpop.trf.xlu0 }
 0x28f   : > { %1351 = vmatprep.mubr.msk.bf16.mxu0 %vm761_vm7, %v757_v54 }
 0x292   : > { %v758_v55 = vpop.trf.xlu0 }
 0x293   : > { %1352 = vmatmul.mubr.msk.bf16.gmra.mrb[12].mxu0 %vm761_vm7, %v758_v55 }
 0x296   : > { %v759_v56 = vpop.trf.xlu0 }
 0x297   : > { %1355 = vmatprep.mubr.msk.bf16.mxu0 %vm761_vm7, %v759_v56 }
 0x29a   : > { %v760_v57 = vpop.trf.xlu0 }
 0x29b   : > { %1356 = vmatmul.mubr.msk.bf16.gmra.mrb[16].mxu0 %vm761_vm7, %v760_v57 }
 0x356   : > { %v1913_v0 = vpop.f32.mrb[4].mxu0 }
 0x357   : > { %v824_v1 = vpop.f32.mrb[5].mxu0 }
 0x358   : > { %v1915_v2 = vpop.f32.mrb[6].mxu0 }
 0x359   : > { %v827_v3 = vpop.f32.mrb[7].mxu0 }
 0x35e   : > { %v1917_v4 = vpop.f32.mrb[8].mxu0 }
 0x35f   : > { %v890_v5 = vmax.f32 %v1913_v0, %v1917_v4  ;;  %v840_v6 = vpop.f32.mrb[9].mxu0 }
 0x360   : > { %v888_v7 = vmax.f32 %v824_v1, %v840_v6  ;;  %v1921_v8 = vpop.f32.mrb[10].mxu0 }
 0x361   : > { %v891_v9 = vmax.f32 %v1915_v2, %v1921_v8  ;;  %v843_v10 = vpop.f32.mrb[11].mxu0 }
 0x362   : > { %v889_v11 = vmax.f32 %v827_v3, %v843_v10 }
 0x366   : > { %v1925_v12 = vpop.f32.mrb[12].mxu0 }
 0x367   : > { %v894_v13 = vmax.f32 %v890_v5, %v1925_v12  ;;  %v856_v14 = vpop.f32.mrb[13].mxu0 }
 0x368   : > { %v892_v15 = vmax.f32 %v888_v7, %v856_v14  ;;  %v1928_v16 = vpop.f32.mrb[14].mxu0 }
 0x369   : > { %v895_v17 = vmax.f32 %v891_v9, %v1928_v16  ;;  %v859_v18 = vpop.f32.mrb[15].mxu0 }
 0x36a   : > { %v893_v19 = vmax.f32 %v889_v11, %v859_v18 }
 0x36e   : > { %v1931_v20 = vpop.f32.mrb[16].mxu0 }
 0x36f   : > { %v898_v21 = vmax.f32 %v894_v13, %v1931_v20  ;;  %v1934_v22 = vpop.f32.mrb[17].mxu0 }
 0x370   : > { %v896_v23 = vmax.f32 %v892_v15, %v1934_v22  ;;  %v1937_v24 = vpop.f32.mrb[18].mxu0 }
 0x371   : > { %v899_v25 = vmax.f32 %v895_v17, %v1937_v24  ;;  %v875_v26 = vpop.f32.mrb[19].mxu0 }
 0x372   : > { %v897_v27 = vmax.f32 %v893_v19, %v875_v26 }
 0x373   : > { %v901_v28 = vmax.f32 %v898_v21, %v899_v25 }
 0x374   : > { %v900_v29 = vmax.f32 %v896_v23, %v897_v27 }
 0x376   : > { %v902_v30 = vmax.f32 %v900_v29, %v901_v28 }
 0x378   : > { %v903_v31 = vrot.slane %v902_v30, 4 }
 0x37a   : > { %v904_v32 = vmax.f32 %v902_v30, %v903_v31 }
 0x37c   : > { %v905_v34 = vrot.slane %v904_v32, 2 }
 0x37e   : > { %v906_v35 = vmax.f32 %v904_v32, %v905_v34 }
 0x380   : > { %v907_v37 = vrot.slane %v906_v35, 1 }
 0x382   : > { %v908_v39 = vmax.f32 %v906_v35, %v907_v37 }
 0x384   : > { %v909_v41 = vmax.f32 %v887_v38, %v908_v39 }
 0x386   : > { %v910_v42 = vsub.f32 %v887_v38, %v909_v41  ;;  %v917_v43 = vrot.slane %v909_v41, %v1940_v40  ;;  %1071 = vst [vmem:[#allocation3] sm:$0x1] %v909_v41 }
 0x388   : > { %v911_v44 = vmul.f32 1.442695, %v910_v42  ;;  %v919_v45 = vsub.f32 %v824_v1, %v917_v43  ;;  %v920_v46 = vsub.f32 %v827_v3, %v917_v43  ;;  %v921_v47 = vsub.f32 %v1913_v0, %v917_v43 }
 0x389   : > { %v922_v48 = vsub.f32 %v1915_v2, %v917_v43  ;;  %v923_v49 = vsub.f32 %v840_v6, %v917_v43  ;;  %v924_v50 = vsub.f32 %v843_v10, %v917_v43  ;;  %v925_v51 = vsub.f32 %v1917_v4, %v917_v43 }
 0x38a   : > { %1512 = vpow2.f32 %v911_v44  ;;  %v926_v52 = vsub.f32 %v1921_v8, %v917_v43  ;;  %v927_v53 = vsub.f32 %v856_v14, %v917_v43  ;;  %v928_v54 = vsub.f32 %v859_v18, %v917_v43 }
 0x38b   : > { %v929_v55 = vsub.f32 %v1925_v12, %v917_v43  ;;  %v930_v56 = vsub.f32 %v1928_v16, %v917_v43  ;;  %v931_v57 = vsub.f32 %v1934_v22, %v917_v43  ;;  %v932_v59 = vsub.f32 %v875_v26, %v917_v43 }
 0x38c   : > { %v933_v62 = vsub.f32 %v1931_v20, %v917_v43  ;;  %v935_v63 = vmul.f32 1.442695, %v919_v45  ;;  %v937_v0 = vmul.f32 1.442695, %v920_v46  ;;  %v939_v1 = vmul.f32 1.442695, %v921_v47 }
 0x38d   : > { %v941_v2 = vmul.f32 1.442695, %v922_v48  ;;  %v934_v3 = vsub.f32 %v1937_v24, %v917_v43  ;;  %v943_v4 = vmul.f32 1.442695, %v923_v49  ;;  %v945_v5 = vmul.f32 1.442695, %v924_v50 }
 0x38e   : > { %1514 = vpow2.f32 %v935_v63  ;;  %v947_v6 = vmul.f32 1.442695, %v925_v51  ;;  %v949_v7 = vmul.f32 1.442695, %v926_v52  ;;  %v951_v8 = vmul.f32 1.442695, %v927_v53 }
 0x38f   : > { %1516 = vpow2.f32 %v937_v0  ;;  %v953_v9 = vmul.f32 1.442695, %v928_v54  ;;  %v955_v11 = vmul.f32 1.442695, %v929_v55  ;;  %v957_v12 = vmul.f32 1.442695, %v930_v56 }
 0x390   : > { %1518 = vpow2.f32 %v939_v1  ;;  %v959_v14 = vmul.f32 1.442695, %v931_v57  ;;  %v961_v15 = vmul.f32 1.442695, %v932_v59  ;;  %v963_v17 = vmul.f32 1.442695, %v933_v62 }
 0x391   : > { %1520 = vpow2.f32 %v941_v2  ;;  %v965_v19 = vmul.f32 1.442695, %v934_v3  ;;  %v967_v1 = vld [vmem:[#allocation4] sm:$0x1] }
 0x392   : > { %1522 = vpow2.f32 %v943_v4 }
 0x393   : > { %1524 = vpow2.f32 %v945_v5 }
 0x394   : > { %v1952_v10 = vpop.eup %1512  ;;  %1526 = vpow2.f32 %v947_v6  ;;  %v994_v6 = vld [vmem:[#allocation5 + $0x10] sm:$0xff] }
 0x395   : > { %1528 = vpow2.f32 %v949_v7  ;;  %v1956_v13 = vrot.slane %v1952_v10, %v1940_v40  ;;  %v968_v3 = vmul.f32 %v1952_v10, %v967_v1  ;;  %v992_v7 = vld [vmem:[#allocation5] sm:$0xff] }
 0x396   : > { %1530 = vpow2.f32 %v951_v8  ;;  %v995_v8 = vld [vmem:[#allocation5 + $0x18] sm:$0xff] }
 0x397   : > { %1532 = vpow2.f32 %v953_v9  ;;  %v1004_v9 = vmul.f32 %v1956_v13, %v994_v6  ;;  %v1005_v60 = vmul.f32 %v1956_v13, %v995_v8 }
 0x398   : > { %v1515_v16 = vpop.eup %1514  ;;  %1534 = vpow2.f32 %v955_v11  ;;  %v993_v11 = vld [vmem:[#allocation5 + $0x8] sm:$0xff] }
 0x399   : > { %v1517_v18 = vpop.eup %1516  ;;  %1536 = vpow2.f32 %v957_v12  ;;  %v1003_v10 = vmul.f32 %v1956_v13, %v993_v11 }
 0x39a   : > { %v1519_v20 = vpop.eup %1518  ;;  %1538 = vpow2.f32 %v959_v14  ;;  %v969_v21 = vadd.f32 %v1517_v18, %v1515_v16  ;;  %v1006_v22 = vpack.c.bf16 %v1517_v18, %v1515_v16  ;;  %v1002_v14 = vmul.f32 %v1956_v13, %v992_v7 }
 0x39b   : > { %v1521_v23 = vpop.eup %1520  ;;  %1540 = vpow2.f32 %v961_v15 }
 0x39c   : > { %v1523_v24 = vpop.eup %1522  ;;  %1542 = vpow2.f32 %v963_v17  ;;  %v970_v25 = vadd.f32 %v1519_v20, %v969_v21  ;;  %1359 = vmatprep.subr.bf16.mxu1 %v1006_v22  ;;  %v1007_v26 = vpack.c.bf16 %v1521_v23, %v1519_v20 }
 0x39d   : > { %v1525_v27 = vpop.eup %1524  ;;  %1360 = vmatpush3.bf16.msra.mxu1 %v1006_v22  ;;  %1544 = vpow2.f32 %v965_v19 }
 0x39e   : > { %v1527_v28 = vpop.eup %1526  ;;  %v971_v29 = vadd.f32 %v1521_v23, %v970_v25  ;;  %1361 = vmatprep.subr.bf16.mxu1 %v1007_v26  ;;  %v1008_v30 = vpack.c.bf16 %v1525_v27, %v1523_v24 }
 0x39f   : > { %v1529_v31 = vpop.eup %1528 }
 0x3a0   : > { %v1531_v32 = vpop.eup %1530  ;;  %v972_v33 = vadd.f32 %v1523_v24, %v971_v29  ;;  %v1009_v34 = vpack.c.bf16 %v1529_v31, %v1527_v28 }
 0x3a1   : > { %v1533_v35 = vpop.eup %1532  ;;  %1362 = vmatpush3.bf16.msra.mxu1 %v1007_v26 }
 0x3a2   : > { %v1535_v36 = vpop.eup %1534  ;;  %v973_v37 = vadd.f32 %v1525_v27, %v972_v33  ;;  %1363 = vmatprep.subr.bf16.mxu1 %v1008_v30  ;;  %v1010_v38 = vpack.c.bf16 %v1533_v35, %v1531_v32 }
 0x3a3   : > { %v1537_v39 = vpop.eup %1536 }
 0x3a4   : > { %v1539_v41 = vpop.eup %1538  ;;  %v974_v42 = vadd.f32 %v1527_v28, %v973_v37  ;;  %v1011_v43 = vpack.c.bf16 %v1537_v39, %v1535_v36 }
 0x3a5   : > { %v1541_v44 = vpop.eup %1540  ;;  %1364 = vmatpush3.bf16.msra.mxu1 %v1008_v30 }
 0x3a6   : > { %v1543_v45 = vpop.eup %1542  ;;  %v975_v46 = vadd.f32 %v1529_v31, %v974_v42  ;;  %1365 = vmatprep.subr.bf16.mxu1 %v1009_v34  ;;  %v1012_v47 = vpack.c.bf16 %v1541_v44, %v1539_v41 }
 0x3a7   : > { %v1545_v48 = vpop.eup %1544 }
 0x3a8   : > { %v976_v49 = vadd.f32 %v1531_v32, %v975_v46  ;;  %v1013_v50 = vpack.c.bf16 %v1545_v48, %v1543_v45 }
 0x3a9   : > { %1366 = vmatpush3.bf16.msra.mxu1 %v1009_v34 }
 0x3aa   : > { %v977_v51 = vadd.f32 %v1533_v35, %v976_v49  ;;  %1367 = vmatprep.subr.bf16.mxu1 %v1010_v38 }
 0x3ac   : > { %v978_v52 = vadd.f32 %v1535_v36, %v977_v51 }
 0x3ad   : > { %1368 = vmatpush3.bf16.msra.mxu1 %v1010_v38 }
 0x3ae   : > { %v979_v53 = vadd.f32 %v1537_v39, %v978_v52  ;;  %1369 = vmatprep.subr.bf16.mxu1 %v1011_v43 }
 0x3b0   : > { %v980_v54 = vadd.f32 %v1539_v41, %v979_v53 }
 0x3b1   : > { %1370 = vmatpush3.bf16.msra.mxu1 %v1011_v43 }
 0x3b2   : > { %v981_v55 = vadd.f32 %v1541_v44, %v980_v54  ;;  %1371 = vmatprep.subr.bf16.mxu1 %v1012_v47 }
 0x3b4   : > { %v982_v56 = vadd.f32 %v1543_v45, %v981_v55 }
 0x3b5   : > { %1372 = vmatpush3.bf16.msra.mxu1 %v1012_v47 }
 0x3b6   : > { %v983_v57 = vadd.f32 %v1545_v48, %v982_v56  ;;  %1373 = vmatprep.subr.bf16.mxu1 %v1013_v50 }
 0x3b8   : > { %v984_v59 = vrot.slane %v983_v57, 4 }
 0x3b9   : > { %1374 = vmatpush3.bf16.msra.mxu1 %v1013_v50 }
 0x3ba   : > { %v985_v62 = vadd.f32 %v984_v59, %v983_v57 }
 0x3bc   : > { %v986_v63 = vrot.slane %v985_v62, 2  ;;  %1376 = vmatmul.mubr.bf16.vlgmr.msra.gmra.mrb[4].mxu1 %v743_v61 }
 0x3be   : > { %v987_v0 = vadd.f32 %v986_v63, %v985_v62 }
 0x3c0   : > { %v988_v2 = vrot.slane %v987_v0, 1 }
 0x3c2   : > { %v989_v4 = vadd.f32 %v988_v2, %v987_v0 }
 0x3c4   : > { %v990_v5 = vadd.f32 %v989_v4, %v968_v3 }
 0x3c6   : > { %991 = vst [vmem:[#allocation4] sm:$0x1] %v990_v5 }
 0x3cd   : > { %v1076_v20 = vld [vmem:[#allocation4] sm:$0x1] (!%p1273_p6) }
 0x3ce   : > { %1546 = vrcp.f32 (!%p1273_p6), %v1076_v20 }
 0x3d8   : > { %v1547_v22 = vpop.eup (!%p1273_p6), %1546 }
 0x3d9   : > { %v1086_v25 = vrot.slane (!%p1273_p6), %v1547_v22, %v1940_v40 }
 0x48f   : > { %v1377_v12 = vpop.f32.mrb[4].mxu1  ;;  %1075 = sbr.rel (%p1273_p6) target bundleno = 1184 (0x4a0), region = 175 }
 0x490   : > { %v1065_v15 = vadd.f32 %v1377_v12, %v1004_v9  ;;  %v1048_v58 = vpop.f32.mrb[5].mxu1 }
 0x491   : > { %v1063_v61 = vadd.f32 %v1048_v58, %v1002_v14  ;;  %v1378_v16 = vpop.f32.mrb[6].mxu1 }
 0x492   : > { %1069 = vst [vmem:[#allocation5 + $0x10] sm:$0xff] %v1065_v15  ;;  %v1066_v17 = vadd.f32 %v1378_v16, %v1005_v60  ;;  %v1051_v18 = vpop.f32.mrb[7].mxu1 }
 0x493   : > { %1067 = vst [vmem:[#allocation5] sm:$0xff] %v1063_v61  ;;  %v1064_v19 = vadd.f32 %v1051_v18, %v1003_v10 }
 0x494   : > { %1070 = vst [vmem:[#allocation5 + $0x18] sm:$0xff] %v1066_v17 }
 0x495   : > { %1068 = vst [vmem:[#allocation5 + $0x8] sm:$0xff] %v1064_v19 }
 0x499   : > { %v1080_v13 = vld [vmem:[#allocation5 + $0x10] sm:$0xff] }
 0x49a   : > { %v1078_v21 = vld [vmem:[#allocation5] sm:$0xff]  ;;  %v1090_v28 = vmul.f32 %v1086_v25, %v1080_v13 }
 0x49b   : > { %v1081_v24 = vld [vmem:[#allocation5 + $0x18] sm:$0xff]  ;;  %v1088_v26 = vmul.f32 %v1086_v25, %v1078_v21 }
 0x49c   : > { %v1079_v23 = vld [vmem:[#allocation5 + $0x8] sm:$0xff]  ;;  %v1091_v29 = vmul.f32 %v1086_v25, %v1081_v24  ;;  %1094 = vst [vmem:[%s1875_s16 + $0x10] sm:$0xff] %v1090_v28 }
 0x49d   : > { %v1089_v27 = vmul.f32 %v1086_v25, %v1079_v23  ;;  %1092 = vst [vmem:[%s1875_s16] sm:$0xff] %v1088_v26 }
 0x49e   : > { %1095 = vst [vmem:[%s1875_s16 + $0x18] sm:$0xff] %v1091_v29 }
 0x49f   : > { %1093 = vst [vmem:[%s1875_s16 + $0x8] sm:$0xff] %v1089_v27 }
 0x4a0 PF: > { %s2070_s26 = sld [smem:[#allocation13_spill]]  ;;  %s1275_s13 = sshll.u32 %s1658_s28, 3 }
 0x4a1   : > { %s1111_s20 = sshll.u32 %s1875_s16, 4  ;;  %s2071_s12 = sld [smem:[#allocation18_spill]]  ;;  %s1975_s20 = int_to_ptr.vmem [resolvable:$true] %s1111_s20 }
 0x4a2   : > { %s1097_s27 = scalar_lea.sflag [#allocation10], %s1866_s18  ;;  %s1548_s14 = scalar_lea.vmem %s1975_s20, 512 }
 0x4a3   : > { %p1549_p7 = scmp.ne.s32.totalorder %s1975_s20, %s1548_s14  ;;  %s1683_s28 = smov [#allocation9]  }
 0x4a4   : > { %s1552_s11 = sshll.u32 %s1683_s28, 4  ;;  %s1553_s11 = int_to_ptr.vmem [resolvable:$false] %s1552_s11 }
 0x4a5   : > { %p1550_p8 = pnand %p1549_p7, %p1821_p11  ;;  %s1554_s16 = scalar_lea.vmem %s1553_s11, 1024 }
 0x4a6   : > { %s1108_s15 = sadd.s32 %s2070_s26, %s1275_s13  ;;  %p1555_p10 = scmp.lt.s32.totalorder %s1975_s20, %s1553_s11 }
 0x4a7   : > { %s1276_s22 = sshll.u32 %s1108_s15, 7  ;;  %p1551_p9 = pneg %p1550_p8 }
 0x4a8   : > { %s1980_s6 = scalar_lea.hbm %s2071_s12, %s1276_s22  ;;  %p1556_p13 = scmp.lt.s32.totalorder %s1554_s16, %s1548_s14 }
 0x4aa   : > { %p1557_p0 = por %p1556_p13, %p1555_p10 }
 0x4ac   : > { %p1558_p2 = pnand %p1557_p0, %p1551_p9 }
 0x4ae   : > { %1561 = shalt.err (!%p1558_p2)
}
 0x4af   : > { %s1562_s26 = scalar_lea.hbm %s1980_s6, 512  ;;  %s1566_s22 = scalar_lea.hbm %s2071_s12, 2048 }
 0x4b0   : > { %p1563_p1 = scmp.ne.s32.totalorder %s1980_s6, %s1562_s26  ;;  %p1567_p5 = scmp.lt.u32.totalorder %s1980_s6, %s2071_s12 }
 0x4b1   : > { %p1568_p6 = scmp.lt.u32.totalorder %s1566_s22, %s1562_s26  ;;  %p1570_p8 = scmp.lt.u32.totalorder %s1562_s26, %s1980_s6 }
 0x4b2   : > { %p1564_p3 = pnand %p1563_p1, %p1821_p11 }
 0x4b3   : > { %p1569_p7 = por %p1568_p6, %p1567_p5 }
 0x4b4   : > { %p1565_p4 = pneg %p1564_p3 }
 0x4b5   : > { %p1571_p9 = por %p1570_p8, %p1569_p7 }
 0x4b7   : > { %p1572_p10 = pnand %p1571_p9, %p1565_p4 }
 0x4b9   : > { %1575 = shalt.err (!%p1572_p10)
}
 0x4ba   : > { %s1684_s14 = smov 128   ;;  %s1685_s28 = smov 256  }
 0x4bb   : > { %s1686_s11 = smov 8  }
 0x4bc   : > { %1388 = dma.vmem_to_hbm [thread:$0]  (%p1821_p11), %s1975_s20, 512, %s1980_s6, %s1097_s27, %s1684_s14, %s1685_s28, %s1686_s11  }
 0x4bd PF: > { %s2072_s16 = sld [smem:[#allocation12_spill]]  ;;  %p1394_p13 = scmp.ge.s32.totalorder %s1674_s8, 2 }
 0x4bf   : > { %p1391_p0 = pnand %p1394_p13, %p1825_p12 }
 0x4c3   : > { %s1126_s15 = sand.u32 1, %s2072_s16  }
 0x4c4   : > { %s1127_s26 = scalar_lea.sflag [#allocation10], %s1126_s15 }
 0x4c5   : > { %1625 = dma.done.wait (!%p1391_p0), %s1127_s26, 512  }
 0x4c6   : > { %1627 = vsyncadd (!%p1391_p0), %s1127_s26, 4294966784  ;;  %s19_s8 = sadd.s32 1, %s1674_s8   ;;  %s2074_s19 = sld [smem:[#allocation14_spill]] }
 0x4c7   : > { %p16_p2 = scmp.ge.s32.totalorder %s19_s8, 10   ;;  %s2075_s18 = sld [smem:[#allocation15_spill]] }
 0x4c8   : > { %s2076_s20 = sld [smem:[#allocation16_spill]]  ;;  %s2077_s21 = smov %s1642_s24 }
 0x4c9   : > { %s2078_s22 = smov %s1638_s23  ;;  %s2079_s23 = smov %s1836_s10 }
 0x4ca   : > { %s2080_s24 = smov %s1646_s25  ;;  %s2081_s25 = smov %s1833_s9 }
 0x4cb   : > { %s2082_s26 = smov %s1662_s29  ;;  %s2083_s27 = smov %s1666_s30 }
 0x4cc   : > { %s2084_s28 = smov %s1670_s7  ;;  %s2085_s29 = smov %s2074_s19 }
 0x4cd   : > { %s2086_s30 = smov %s2075_s18  ;;  %18 = sbr.rel (!%p16_p2) target bundleno = 9 (0x9), region = 231 }
 0x4ce   : > { %s2087_s7 = smov %s2076_s20 }
 0x4d4   :  { %1132 = vsyncpa [#allocation10], 1 }
 0x4d5   :  { %1134 = vsyncpa [#allocation10 + $0x1], 1 }

</bundles_post_ra>
